<compile_context>
chip_gen: v6e
topology: v6e:2x2x1
jax: 0.10.0
libtpu: 0.0.40
codegen_flags: <defaults>
</compile_context>

<pallas_src>
import functools

import jax
import jax.numpy as jnp
from jax.experimental import pallas as pl
from jax.experimental.pallas import tpu as pltpu


def _round_up(x, m):
    return ((x + m - 1) // m) * m


def _vmem_capacity_bytes():
    """Physical VMEM per TensorCore (64 MiB v7x, 128 MiB v5e/v6e)."""
    try:
        return int(pltpu.get_tpu_info().vmem_capacity_bytes)
    except Exception:
        return 64 << 20  # conservative (v7x-sized) fallback


def _pick_tile_m(n, itemsize, target):
    """Batch-tile rows.

    Fixed target (ragged last tile handled via a cdiv grid + clipped output
    writes), rounded to the sublane min-tile (16 rows for sub-32-bit inputs),
    and capped so the grid has >= 2 batch tiles whenever N permits so the
    'parallel' batch axis can span both v7x TensorCores.
    """
    min_tile = 16 if itemsize < 4 else 8
    if n <= min_tile:
        return min_tile
    if n < 2 * min_tile:
        return _round_up(n, min_tile)
    cap = _round_up(pl.cdiv(n, 2), min_tile)  # guarantees >= 2 batch tiles
    return min(_round_up(target, min_tile), cap)


def _highway_fused_kernel(x_ref, w_ref, b_ref, o_ref, act_ref, *,
                          input_dim, weights_resident):
    """One (batch_tile, layer) grid step of the fused Highway forward."""
    layer = pl.program_id(1)

    # Layer 0: load the input tile into the f32 running-activation scratch.
    @pl.when(layer == 0)
    def _():
        act_ref[...] = x_ref[...].astype(jnp.float32)

    x = act_ref[...]                                   # running activation (f32)

    if weights_resident:
        w = w_ref[layer]                               # (D, 2D) slice of the resident stack
        b = b_ref[layer]                               # (1, 2D)
    else:
        w = w_ref[...]                                 # streamed per-layer block
        b = b_ref[...]

    # Single (tile_m, D) x (D, 2D) MXU matmul, f32 accumulation.
    proj = jnp.dot(x.astype(w.dtype), w, preferred_element_type=jnp.float32)
    proj = proj + b.astype(jnp.float32)

    # Lane-aligned column split when D % 128 == 0 (typical ELMo dims).
    hidden = jnp.maximum(proj[:, :input_dim], 0.0)     # relu
    gate = jax.nn.sigmoid(proj[:, input_dim:])

    # out = gate*x + (1-gate)*hidden  ==  hidden + gate*(x - hidden)
    new = hidden + gate * (x - hidden)
    act_ref[...] = new

    # Last layer: single HBM write per batch tile (clipped for ragged tiles).
    @pl.when(layer == pl.num_programs(1) - 1)
    def _():
        o_ref[...] = new.astype(o_ref.dtype)


def highway_forward(x, params):
    """Fused Highway forward.

    x: (N, D)
    params: (w, b) with
        w: (L, D, 2D)  -- pre-transposed nn.Linear(D, 2D) weights
                          (hidden cols [0:D], gate cols [D:2D])
        b: (L, 1, 2D)  -- biases, gate half initialized to 1.
    """
    w, b = params
    N, D = x.shape
    L = w.shape[0]

    x_itemsize = jnp.dtype(x.dtype).itemsize
    w_itemsize = jnp.dtype(w.dtype).itemsize
    b_itemsize = jnp.dtype(b.dtype).itemsize
    out_itemsize = x_itemsize

    vmem_cap = _vmem_capacity_bytes()

    # ---- Weight residency decision ------------------------------------
    # Full-stack weight/bias bytes; the blocked input is still double-buffered
    # by default, so budget 2x against ~60% of physical VMEM.
    # TODO(synk): for very large D on v7x (64 MiB VMEM), cast weights to bf16
    # before calling (MXU takes bf16 anyway) so they stay resident.
    w_bytes_full = L * D * (2 * D) * w_itemsize
    b_bytes_full = L * (2 * D) * b_itemsize
    weights_resident = 2 * (w_bytes_full + b_bytes_full) <= int(0.6 * vmem_cap)

    # 256-row tiles are enough once weights are resident; when streaming, use
    # bigger tiles so the per-step 2*D^2 weight DMA hides under the matmul.
    # TODO(synk): v6e streamed weights ideally want tile_m >= ~700 rows.
    target = 256 if weights_resident else 512
    tile_m = _pick_tile_m(N, x_itemsize, target)
    n_m_tiles = pl.cdiv(N, tile_m)
    grid = (n_m_tiles, L)  # batch tiles (parallel), layers (arbitrary, carried)

    # ---- Block specs ----------------------------------------------------
    if weights_resident:
        # Constant block index => DMA'd once, stays in VMEM for all grid steps.
        w_spec = pl.BlockSpec((L, D, 2 * D), lambda i, l: (0, 0, 0))
        b_spec = pl.BlockSpec((L, 1, 2 * D), lambda i, l: (0, 0, 0))
    else:
        w_spec = pl.BlockSpec((None, D, 2 * D), lambda i, l: (l, 0, 0))
        b_spec = pl.BlockSpec((None, 1, 2 * D), lambda i, l: (l, 0, 0))

    # ---- VMEM budget / compiler params ---------------------------------
    act_bytes = tile_m * D * 4
    io_bytes = 2 * tile_m * D * x_itemsize + 2 * tile_m * D * out_itemsize
    if weights_resident:
        w_vmem = 2 * (w_bytes_full + b_bytes_full)
    else:
        w_vmem = 2 * (D * (2 * D) * w_itemsize + (2 * D) * b_itemsize)
    vmem_needed = act_bytes + io_bytes + w_vmem
    vmem_limit = int(min(vmem_cap,
                         max(int(vmem_needed * 1.25) + (2 << 20), 16 << 20)))

    # ---- Cost estimate (actual weight traffic) --------------------------
    weight_traffic = (1 if weights_resident else n_m_tiles) * (
        w_bytes_full + b_bytes_full)
    cost = pl.CostEstimate(
        flops=2 * N * D * (2 * D) * L,
        transcendentals=N * D * L,               # sigmoid
        bytes_accessed=(N * D * x_itemsize + N * D * out_itemsize
                        + weight_traffic),
    )

    kernel = functools.partial(_highway_fused_kernel, input_dim=D,
                               weights_resident=weights_resident)

    return pl.pallas_call(
        kernel,
        out_shape=jax.ShapeDtypeStruct((N, D), x.dtype),
        grid_spec=pltpu.PrefetchScalarGridSpec(
            num_scalar_prefetch=0,
            grid=grid,
            in_specs=[
                pl.BlockSpec((tile_m, D), lambda i, l: (i, 0)),   # x
                w_spec,                                           # W  (L,D,2D)
                b_spec,                                           # b  (L,1,2D)
            ],
            out_specs=pl.BlockSpec((tile_m, D), lambda i, l: (i, 0)),
            scratch_shapes=[pltpu.VMEM((tile_m, D), jnp.float32)],
        ),
        compiler_params=pltpu.CompilerParams(
            dimension_semantics=("parallel", "arbitrary"),
            vmem_limit_bytes=vmem_limit),
        cost_estimate=cost,
    )(x, w, b)


def init_highway_params(key, input_dim, num_layers, dtype=jnp.float32):
    """Synthetic params matching nn.Linear(D, 2D) per layer.

    PyTorch stores weight as (2D, D) and computes x @ W^T; here W^T is stored
    directly as (D, 2D): hidden projection in cols [0:D], gate in [D:2D].
    The gate bias is filled with 1.0 as in the module's __init__.
    """
    scale = 1.0 / jnp.sqrt(jnp.float32(input_dim))
    w_l, b_l = [], []
    for layer in range(num_layers):
        kw, kb = jax.random.split(jax.random.fold_in(key, layer))
        w_l.append((jax.random.uniform(kw, (input_dim, 2 * input_dim),
                                       minval=-1.0, maxval=1.0)
                    * scale).astype(dtype))
        bias = jax.random.uniform(kb, (1, 2 * input_dim),
                                  minval=-1.0, maxval=1.0) * scale
        bias = bias.at[:, input_dim:].set(1.0)
        b_l.append(bias.astype(jnp.float32))
    return jnp.stack(w_l), jnp.stack(b_l)      # (L, D, 2D), (L, 1, 2D)


def highway_reference(x, params):
    """Plain-JAX reference mirroring the PyTorch forward."""
    w, b = params
    D = x.shape[1]
    curr = x.astype(jnp.float32)
    for l in range(w.shape[0]):
        proj = curr @ w[l].astype(jnp.float32) + b[l]
        hidden = jnp.maximum(proj[:, :D], 0.0)
        gate = jax.nn.sigmoid(proj[:, D:])
        curr = gate * curr + (1.0 - gate) * hidden
    return curr.astype(x.dtype)


if __name__ == "__main__":
    key = jax.random.PRNGKey(0)
    batch, input_dim, num_layers = 8, 128, 2

    kx, kp = jax.random.split(key)
    x = jax.random.normal(kx, (batch, input_dim), dtype=jnp.float32)
    params = init_highway_params(kp, input_dim, num_layers)

    out = jax.block_until_ready(highway_forward(x, params))

    ref = highway_reference(x, params)
    assert out.shape == (batch, input_dim)
    assert jnp.allclose(out, ref, atol=1e-5, rtol=1e-5), "mismatch vs reference"

    print("KERNEL_OK")
</pallas_src>

<mosaic_0001>
module attributes {stable_mosaic.version = 11 : i64} {
  func.func @_highway_fused_kernel(%arg0: i32, %arg1: i32, %arg2: memref<8x128xf32, #tpu.memory_space<vmem>>, %arg3: memref<2x128x256xf32, #tpu.memory_space<vmem>>, %arg4: memref<2x1x256xf32, #tpu.memory_space<vmem>>, %arg5: memref<8x128xf32, #tpu.memory_space<vmem>>, %arg6: memref<8x128xf32, #tpu.memory_space<vmem>>) attributes {dimension_semantics = [#tpu.dimension_semantics<parallel>, #tpu.dimension_semantics<arbitrary>], iteration_bounds = array<i64: 1, 2>, scalar_prefetch = 0 : i64, scratch_operands = 1 : i64, tpu.core_type = #tpu.core_type<tc>, window_params = [{transform_indices = @transform_0, window_bounds = array<i64: 8, 128>}, {pipeline_mode = #tpu.pipeline_mode<synchronous>, transform_indices = @transform_1, window_bounds = array<i64: 2, 128, 256>}, {pipeline_mode = #tpu.pipeline_mode<synchronous>, transform_indices = @transform_2, window_bounds = array<i64: 2, 1, 256>}, {transform_indices = @transform_3, window_bounds = array<i64: 8, 128>}]} {
    %c0_i32 = arith.constant 0 : i32
    %0 = arith.cmpi eq, %arg1, %c0_i32 : i32
    %1 = arith.extui %0 : i1 to i32
    %c0_i32_0 = arith.constant 0 : i32
    %2 = arith.cmpi ne, %1, %c0_i32_0 : i32
    scf.if %2 {
      %c0_11 = arith.constant 0 : index
      %c0_12 = arith.constant 0 : index
      %29 = vector.load %arg2[%c0_11, %c0_12] : memref<8x128xf32, #tpu.memory_space<vmem>>, vector<8x128xf32>
      %c0_13 = arith.constant 0 : index
      %c0_14 = arith.constant 0 : index
      %30 = vector.load %arg6[%c0_13, %c0_14] : memref<8x128xf32, #tpu.memory_space<vmem>>, vector<8x128xf32>
      tpu.vector_store %arg6[%c0_13, %c0_14], %29 {strides = array<i32>} : memref<8x128xf32, #tpu.memory_space<vmem>>, vector<8x128xf32>,
    } else {
    }
    %c0 = arith.constant 0 : index
    %c0_1 = arith.constant 0 : index
    %3 = vector.load %arg6[%c0, %c0_1] : memref<8x128xf32, #tpu.memory_space<vmem>>, vector<8x128xf32>
    %4 = arith.index_cast %arg1 : i32 to index
    %c0_2 = arith.constant 0 : index
    %c0_3 = arith.constant 0 : index
    %5 = vector.load %arg3[%4, %c0_2, %c0_3] : memref<2x128x256xf32, #tpu.memory_space<vmem>>, vector<1x128x256xf32>
    %6 = vector.shape_cast %5 : vector<1x128x256xf32> to vector<128x256xf32>
    %7 = arith.index_cast %arg1 : i32 to index
    %c0_4 = arith.constant 0 : index
    %c0_5 = arith.constant 0 : index
    %8 = vector.load %arg4[%7, %c0_4, %c0_5] : memref<2x1x256xf32, #tpu.memory_space<vmem>>, vector<1x1x256xf32>
    %9 = vector.shape_cast %8 : vector<1x1x256xf32> to vector<1x256xf32>
    %cst = arith.constant dense<0.000000e+00> : vector<8x256xf32>
    %10 = tpu.matmul %3, %6, %cst {dimension_numbers = #tpu.dot_dimension_numbers<[1], [0], [0], [1], [0, 0, 1, 1], [], []>} : vector<8x128xf32>, vector<128x256xf32>, vector<8x256xf32> -> vector<8x256xf32>
    %11 = vector.broadcast %9 : vector<1x256xf32> to vector<8x256xf32>
    %12 = arith.addf %10, %11 : vector<8x256xf32>
    %13 = vector.extract_strided_slice %12 {offsets = [0, 0], sizes = [8, 128], strides = [1, 1]} : vector<8x256xf32> to vector<8x128xf32>
    %cst_6 = arith.constant 0.000000e+00 : f32
    %14 = vector.broadcast %cst_6 : f32 to vector<8x128xf32>
    %15 = arith.maximumf %13, %14 : vector<8x128xf32>
    %16 = vector.extract_strided_slice %12 {offsets = [0, 128], sizes = [8, 128], strides = [1, 1]} : vector<8x256xf32> to vector<8x128xf32>
    %17 = arith.negf %16 : vector<8x128xf32>
    %18 = math.exp %17 : vector<8x128xf32>
    %cst_7 = arith.constant 1.000000e+00 : f32
    %19 = vector.broadcast %cst_7 : f32 to vector<8x128xf32>
    %20 = arith.addf %19, %18 : vector<8x128xf32>
    %21 = arith.divf %19, %20 : vector<8x128xf32>
    %22 = arith.subf %3, %15 : vector<8x128xf32>
    %23 = arith.mulf %21, %22 : vector<8x128xf32>
    %24 = arith.addf %15, %23 : vector<8x128xf32>
    %c0_8 = arith.constant 0 : index
    %c0_9 = arith.constant 0 : index
    %25 = vector.load %arg6[%c0_8, %c0_9] : memref<8x128xf32, #tpu.memory_space<vmem>>, vector<8x128xf32>
    tpu.vector_store %arg6[%c0_8, %c0_9], %24 {strides = array<i32>} : memref<8x128xf32, #tpu.memory_space<vmem>>, vector<8x128xf32>,
    %c1_i32 = arith.constant 1 : i32
    %26 = arith.cmpi eq, %arg1, %c1_i32 : i32
    %27 = arith.extui %26 : i1 to i32
    %c0_i32_10 = arith.constant 0 : i32
    %28 = arith.cmpi ne, %27, %c0_i32_10 : i32
    scf.if %28 {
      %c0_11 = arith.constant 0 : index
      %c0_12 = arith.constant 0 : index
      %29 = vector.load %arg5[%c0_11, %c0_12] : memref<8x128xf32, #tpu.memory_space<vmem>>, vector<8x128xf32>
      tpu.vector_store %arg5[%c0_11, %c0_12], %24 {strides = array<i32>} : memref<8x128xf32, #tpu.memory_space<vmem>>, vector<8x128xf32>,
    } else {
    }
    return
  }
  func.func @transform_0(%arg0: i32, %arg1: i32) -> (i32, i32) {
    %c0_i32 = arith.constant 0 : i32
    %c0_i32_0 = arith.constant 0 : i32
    return %arg0, %c0_i32 : i32, i32
  }
  func.func @transform_1(%arg0: i32, %arg1: i32) -> (i32, i32, i32) {
    %c0_i32 = arith.constant 0 : i32
    %c0_i32_0 = arith.constant 0 : i32
    %c0_i32_1 = arith.constant 0 : i32
    %c0_i32_2 = arith.constant 0 : i32
    return %c0_i32, %c0_i32_0, %c0_i32_1 : i32, i32, i32
  }
  func.func @transform_2(%arg0: i32, %arg1: i32) -> (i32, i32, i32) {
    %c0_i32 = arith.constant 0 : i32
    %c0_i32_0 = arith.constant 0 : i32
    %c0_i32_1 = arith.constant 0 : i32
    %c0_i32_2 = arith.constant 0 : i32
    return %c0_i32, %c0_i32_0, %c0_i32_1 : i32, i32, i32
  }
  func.func @transform_3(%arg0: i32, %arg1: i32) -> (i32, i32) {
    %c0_i32 = arith.constant 0 : i32
    %c0_i32_0 = arith.constant 0 : i32
    return %arg0, %c0_i32 : i32, i32
  }
}

</mosaic_0001>

<bundles_post_ra>
// kernel: tpu_custom_call.1
= control target key start
LH: loop header
LB: loop body
LE: loop exit
PB: predicated region body
PF: predicated region fallthrough
CT: control target
= control target key end

     0   :  { %8 = vsyncpa [#allocation4], 0  ;;  %s833_s0 = inlined_call_operand.hbm [shape: f32[8,128], index: 0, kind: input, shape index: {}]   ;;  %s834_s1 = inlined_call_operand.hbm [shape: f32[2,128,256], index: 1, kind: input, shape index: {}]   ;;  %s835_s2 = inlined_call_operand.hbm [shape: f32[2,1,256], index: 2, kind: input, shape index: {}]   ;;  %s836_s3 = inlined_call_operand.hbm [shape: f32[8,128], index: 3, kind: output, shape index: {}]  }
   0x1   :  { %9 = vsyncpa [#allocation7], 0 }
   0x2   :  { %10 = vsyncpa [#allocation5], 0  ;;  %s688_s12 = smov 0   ;;  %s690_s13 = smov 0  }
   0x3   :  { %s692_s14 = smov 0  }
   0x4 LB: > { %s659_s15 = smov [#allocation6]   ;;  %s430_s17 = sadd.s32 4294967295, %s657_s14   ;;  %s657_s14 = sphi %s692_s14, %s16_s14   ;;  %s653_s13 = sphi %s690_s13, %s843_s13   ;;  %s649_s12 = sphi %s688_s12, %s842_s12  }
   0x5   : > { %s152_s16 = sshll.u32 %s659_s15, 4  ;;  %p431_p0 = scmp.ge.s32.totalorder %s657_s14, 1  ;;  %s153_s16 = int_to_ptr.vmem [resolvable:$true] %s152_s16 }
   0x6   : > { %p127_p1 = scmp.lt.s32.totalorder %s657_s14, 3  ;;  %p708_p2 = scmp.eq.s32.totalorder %s430_s17, 0 }
   0x7   : > { %s25_s21 = sadd.s32 1, %s653_s13  ;;  %s660_s23 = smov [#allocation3]  }
   0x8   : > { %p712_p3 = pnand %p431_p0, %p127_p1  ;;  %p725_p6 = scmp.ge.s32.totalorder %s25_s21, 2 }
   0x9   : > { %s142_s24 = sshll.u32 %s660_s23, 4  ;;  %s532_s25 = scalar_lea.vmem %s153_s16, 8192  ;;  %s143_s24 = int_to_ptr.vmem [resolvable:$true] %s142_s24 }
   0xa   : > { %p466_p4 = pneg %p712_p3  ;;  %p533_p8 = scmp.ne.s32.totalorder %s153_s16, %s532_s25 }
   0xb   : > { %p540_p11 = scmp.lt.s32.totalorder %s153_s16, %s153_s16  ;;  %p541_p12 = scmp.lt.s32.totalorder %s532_s25, %s532_s25 }
   0xc   : > { %p720_p5 = pnand %p708_p2, %p466_p4 }
   0xd   : > { %p542_p13 = por %p541_p12, %p540_p11 }
   0xe   : > { %p523_p7 = pneg %p720_p5 }
  0x10   : > { %p535_p9 = pnand %p533_p8, %p523_p7 }
  0x12   : > { %p536_p10 = pneg %p535_p9 }
  0x14   : > { %p543_p0 = pnand %p542_p13, %p536_p10 }
  0x16   : > { %546 = shalt.err (!%p543_p0)
}
  0x17   : > { %s661_s26 = smov 256   ;;  %s662_s27 = smov 16  }
  0x18   : > { %472 = dma.hbm_to_vmem [thread:$0]  (!%p720_p5), %s834_s1, 8192, %s153_s16, [#allocation7], %s661_s26, %s661_s26, %s662_s27  }
  0x19   : > { %s845_s21 = smov (%p725_p6, %s25_s21), 0  ;;  %s558_s30 = scalar_lea.vmem %s143_s24, 128 }
  0x1a   : > { %p559_p1 = scmp.ne.s32.totalorder %s143_s24, %s558_s30  ;;  %p566_p9 = scmp.lt.s32.totalorder %s143_s24, %s143_s24 }
  0x1b   : > { %p567_p10 = scmp.lt.s32.totalorder %s558_s30, %s558_s30 }
  0x1c   : > { %p561_p4 = pnand %p559_p1, %p523_p7 }
  0x1d   : > { %p568_p11 = por %p567_p10, %p566_p9 }
  0x1e   : > { %p562_p8 = pneg %p561_p4 }
  0x20   : > { %p569_p12 = pnand %p568_p11, %p562_p8 }
  0x22   : > { %572 = shalt.err (!%p569_p12)
}
  0x23   : > { %469 = dma.hbm_to_vmem [thread:$0]  (!%p720_p5), %s833_s0, 128, %s143_s24, [#allocation4]  }
  0x24   : > { %s663_s6 = smov [#allocation8]  }
  0x25   : > { %s165_s7 = sshll.u32 %s663_s6, 4  ;;  %s166_s7 = int_to_ptr.vmem [resolvable:$true] %s165_s7 }
  0x26   : > { %s584_s8 = scalar_lea.vmem %s166_s7, 64  ;;  %p592_p1 = scmp.lt.s32.totalorder %s166_s7, %s166_s7 }
  0x27   : > { %p585_p6 = scmp.ne.s32.totalorder %s166_s7, %s584_s8  ;;  %p593_p4 = scmp.lt.s32.totalorder %s584_s8, %s584_s8 }
  0x29   : > { %p587_p13 = pnand %p585_p6, %p523_p7  ;;  %p594_p8 = por %p593_p4, %p592_p1 }
  0x2b   : > { %p588_p0 = pneg %p587_p13 }
  0x2d   : > { %p595_p9 = pnand %p594_p8, %p588_p0 }
  0x2f   : > { %598 = shalt.err (!%p595_p9)
}
  0x30   : > { %s664_s9 = smov 32   ;;  %s665_s10 = smov 2  }
  0x31   : > { %475 = dma.hbm_to_vmem [thread:$0]  (!%p720_p5), %s835_s2, 64, %s166_s7, [#allocation7], %s664_s9, %s664_s9, %s665_s10  }
  0x32   : > { %181 = sbr.rel (%p712_p3) target bundleno = 352 (0x160), region = 32 }
  0x37   : > { %636 = dma.done.wait (%p708_p2), [#allocation4], 128  }
  0x38   : > { %638 = vsyncadd (%p708_p2), [#allocation4], 4294967168 }
  0x39   : > { %640 = dma.done.wait (%p708_p2), [#allocation7], 8256  }
  0x3a   : > { %642 = vsyncadd (%p708_p2), [#allocation7], 4294959040  ;;  %p439_p7 = scmp.ne.s32.totalorder %s649_s12, 0 }
  0x3c   : > { %206 = sbr.rel (%p439_p7) target bundleno = 67 (0x43), region = 48 }
  0x41   : > { %v207_v0 = vld [vmem:[#allocation3] sm:$0xff] }
  0x42   : > { %208 = vst [vmem:[#allocation2] sm:$0xff] %v207_v0 }
  0x43 PF: > { %s449_s16 = sshll.u32 %s649_s12, 8  ;;  %v666_v1 = vmov 0.0   ;;  %v249_v35 = vlaneseq  ;;  %s442_s18 = sshll.u32 %s649_s12, 1 }
  0x44   : > { %323 = vmatprep.mubr.f32.mxu0 %v666_v1  ;;  %s771_s19 = scalar_lea.vmem [#allocation6], %s449_s16  ;;  %s246_s20 = scalar_lea.vmem [#allocation8], %s442_s18 }
  0x45   : > { %v244_v2 = vld [vmem:[%s771_s19 + $0xf8] sm:$0xff]  ;;  %v243_v3 = vld [vmem:[%s771_s19 + $0xf0] sm:$0xff]  ;;  %v242_v4 = vld [vmem:[%s771_s19 + $0xe8] sm:$0xff]  ;;  %v250_v36 = vshrl.u32 %v249_v35, 7  ;;  %p444_p2 = scmp.ne.s32.totalorder %s649_s12, 1 }
  0x46   : > { %259 = vmatprep.subr.mxu0 %v244_v2  ;;  %v241_v5 = vld [vmem:[%s771_s19 + $0xe0] sm:$0xff]  ;;  %v240_v6 = vld [vmem:[%s771_s19 + $0xd8] sm:$0xff]  ;;  %v239_v7 = vld [vmem:[%s771_s19 + $0xd0] sm:$0xff] }
  0x47   : > { %260 = vmatpush1.msra.mxu0 %v243_v3  ;;  %v238_v8 = vld [vmem:[%s771_s19 + $0xc8] sm:$0xff]  ;;  %v237_v9 = vld [vmem:[%s771_s19 + $0xc0] sm:$0xff]  ;;  %v236_v10 = vld [vmem:[%s771_s19 + $0xb8] sm:$0xff]  ;;  %v255_v37 = vsub.s32 1, %v250_v36  ;;  %v251_v44 = vsub.s32 0, %v250_v36 }
  0x48   : > { %261 = vmatprep.subr.mxu0 %v242_v4  ;;  %v235_v11 = vld [vmem:[%s771_s19 + $0xb0] sm:$0xff]  ;;  %v234_v12 = vld [vmem:[%s771_s19 + $0xa8] sm:$0xff]  ;;  %v233_v13 = vld [vmem:[%s771_s19 + $0xa0] sm:$0xff] }
  0x49   : > { %262 = vmatpush1.msra.mxu0 %v241_v5  ;;  %v232_v14 = vld [vmem:[%s771_s19 + $0x98] sm:$0xff]  ;;  %v231_v15 = vld [vmem:[%s771_s19 + $0x90] sm:$0xff]  ;;  %v230_v16 = vld [vmem:[%s771_s19 + $0x88] sm:$0xff] }
  0x4a   : > { %263 = vmatprep.subr.mxu0 %v240_v6  ;;  %v229_v17 = vld [vmem:[%s771_s19 + $0x80] sm:$0xff]  ;;  %v228_v18 = vld [vmem:[%s771_s19 + $0x78] sm:$0xff]  ;;  %v227_v19 = vld [vmem:[%s771_s19 + $0x70] sm:$0xff] }
  0x4b   : > { %264 = vmatpush1.msra.mxu0 %v239_v7  ;;  %v226_v20 = vld [vmem:[%s771_s19 + $0x68] sm:$0xff]  ;;  %v225_v21 = vld [vmem:[%s771_s19 + $0x60] sm:$0xff]  ;;  %v224_v22 = vld [vmem:[%s771_s19 + $0x58] sm:$0xff] }
  0x4c   : > { %265 = vmatprep.subr.mxu0 %v238_v8  ;;  %v223_v23 = vld [vmem:[%s771_s19 + $0x50] sm:$0xff]  ;;  %v222_v24 = vld [vmem:[%s771_s19 + $0x48] sm:$0xff]  ;;  %v221_v25 = vld [vmem:[%s771_s19 + $0x40] sm:$0xff] }
  0x4d   : > { %266 = vmatpush1.msra.mxu0 %v237_v9  ;;  %v220_v26 = vld [vmem:[%s771_s19 + $0x38] sm:$0xff]  ;;  %v219_v27 = vld [vmem:[%s771_s19 + $0x30] sm:$0xff]  ;;  %v218_v28 = vld [vmem:[%s771_s19 + $0x28] sm:$0xff] }
  0x4e   : > { %267 = vmatprep.subr.mxu0 %v236_v10  ;;  %v217_v29 = vld [vmem:[%s771_s19 + $0x20] sm:$0xff]  ;;  %v216_v30 = vld [vmem:[%s771_s19 + $0x18] sm:$0xff]  ;;  %v215_v31 = vld [vmem:[%s771_s19 + $0x10] sm:$0xff] }
  0x4f   : > { %268 = vmatpush1.msra.mxu0 %v235_v11  ;;  %v214_v32 = vld [vmem:[%s771_s19 + $0x8] sm:$0xff]  ;;  %v213_v33 = vld [vmem:[%s771_s19] sm:$0xff] }
  0x50   : > { %269 = vmatprep.subr.mxu0 %v234_v12  ;;  %v209_v34 = vld [vmem:[#allocation2] sm:$0xff] }
  0x51   : > { %270 = vmatpush1.msra.mxu0 %v233_v13  ;;  %v247_v38 = vld [vmem:[%s246_s20] sm:$0x3] }
  0x52   : > { %271 = vmatprep.subr.mxu0 %v232_v14  ;;  %v256_v39 = vrot.slane %v247_v38, %v255_v37  ;;  %v252_v47 = vrot.slane %v247_v38, %v251_v44 }
  0x53   : > { %272 = vmatpush1.msra.mxu0 %v231_v15 }
  0x54   : > { %273 = vmatprep.subr.mxu0 %v230_v16 }
  0x55   : > { %274 = vmatpush1.msra.mxu0 %v229_v17 }
  0x56   : > { %275 = vmatprep.subr.mxu0 %v228_v18 }
  0x57   : > { %276 = vmatpush1.msra.mxu0 %v227_v19 }
  0x58   : > { %277 = vmatprep.subr.mxu0 %v226_v20 }
  0x59   : > { %278 = vmatpush1.msra.mxu0 %v225_v21 }
  0x5a   : > { %279 = vmatprep.subr.mxu0 %v224_v22 }
  0x5b   : > { %280 = vmatpush1.msra.mxu0 %v223_v23 }
  0x5c   : > { %281 = vmatprep.subr.mxu0 %v222_v24 }
  0x5d   : > { %282 = vmatpush1.msra.mxu0 %v221_v25 }
  0x5e   : > { %283 = vmatprep.subr.mxu0 %v220_v26 }
  0x5f   : > { %284 = vmatpush1.msra.mxu0 %v219_v27 }
  0x60   : > { %285 = vmatprep.subr.mxu0 %v218_v28 }
  0x61   : > { %286 = vmatpush1.msra.mxu0 %v217_v29 }
  0x62   : > { %287 = vmatprep.subr.mxu0 %v216_v30 }
  0x63   : > { %288 = vmatpush1.msra.mxu0 %v215_v31 }
  0x64   : > { %289 = vmatprep.subr.mxu0 %v214_v32 }
  0x65   : > { %290 = vmatpush1.msra.mxu0 %v213_v33 }
  0x66   : > { %324 = vmatmul.mubr.f32.vlgmr.msra.gmra.mxu0 %v209_v34 }
 0x126   : > { %v325_v40 = vpop.f32.mrf.mxu0 }
 0x127   : > { %v326_v48 = vadd.f32 %v325_v40, %v252_v47 }
 0x128   : > { %v327_v41 = vpop.f32.mrf.mxu0 }
 0x129   : > { %v328_v42 = vadd.f32 %v327_v41, %v256_v39  ;;  %v330_v49 = vmax.f32 %v326_v48, 0.0 }
 0x12b   : > { %v443_v43 = vmul.f32 -1.442695, %v328_v42  ;;  %v337_v50 = vsub.f32 %v209_v34, %v330_v49 }
 0x12d   : > { %517 = vpow2.f32 %v443_v43 }
 0x13a   : > { %v518_v45 = vpop.eup %517 }
 0x13b   : > { %v334_v46 = vadd.f32 1.0, %v518_v45 }
 0x13d   : > { %519 = vrcp.f32 %v334_v46 }
 0x14a   : > { %v520_v51 = vpop.eup %519 }
 0x14b   : > { %v338_v52 = vmul.f32 %v520_v51, %v337_v50  ;;  %344 = sbr.rel (%p444_p2) target bundleno = 337 (0x151), region = 52 }
 0x14d   : > { %v339_v53 = vadd.f32 %v338_v52, %v330_v49 }
 0x14f   : > { %340 = vst [vmem:[#allocation2] sm:$0xff] %v339_v53 }
 0x150   : > { %345 = vst [vmem:[#allocation9] sm:$0xff] %v339_v53 }
 0x151 PF: > { %p809_p3 = scmp.eq.s32.totalorder %s430_s17, 1  ;;  %s667_s23 = smov [#allocation9]  }
 0x152   : > { %s355_s24 = sshll.u32 %s667_s23, 4  ;;  %s356_s24 = int_to_ptr.vmem [resolvable:$true] %s355_s24 }
 0x153   : > { %s599_s25 = scalar_lea.vmem %s356_s24, 128  ;;  %p606_p12 = scmp.lt.s32.totalorder %s356_s24, %s356_s24 }
 0x154   : > { %p600_p5 = scmp.ne.s32.totalorder %s356_s24, %s599_s25  ;;  %p607_p6 = scmp.lt.s32.totalorder %s599_s25, %s599_s25 }
 0x156   : > { %p601_p10 = pnand %p600_p5, %p809_p3  ;;  %p608_p13 = por %p607_p6, %p606_p12 }
 0x158   : > { %p602_p11 = pneg %p601_p10 }
 0x15a   : > { %p609_p0 = pnand %p608_p13, %p602_p11 }
 0x15c   : > { %612 = shalt.err (!%p609_p0)
}
 0x15d   : > { %463 = dma.vmem_to_hbm [thread:$0]  (%p809_p3), %s356_s24, 128, %s836_s3, [#allocation5]  }
 0x15e   : > { %644 = dma.done.wait (%p809_p3), [#allocation5], 128  }
 0x15f   : > { %646 = vsyncadd (%p809_p3), [#allocation5], 4294967168 }
 0x160 PF: > { %s16_s14 = sadd.s32 1, %s657_s14   ;;  %s842_s12 = smov %s653_s13 }
 0x161   : > { %p13_p1 = scmp.ge.s32.totalorder %s16_s14, 4   ;;  %s843_s13 = smov %s845_s21 }
 0x163   :  { %15 = sbr.rel (!%p13_p1) target bundleno = 4 (0x4), region = 81 }
 0x168   :  { %368 = vsyncpa [#allocation4], 1 }
 0x169   :  { %370 = vsyncpa [#allocation4 + $0x1], 1 }
 0x16a   :  { %371 = vsyncpa [#allocation7], 1 }
 0x16b   :  { %372 = vsyncpa [#allocation5], 1 }
 0x16c   :  { %374 = vsyncpa [#allocation5 + $0x1], 1 }

</bundles_post_ra>
